<compile_context>
chip_gen: v6e
topology: v6e:2x2x1
jax: 0.10.0
libtpu: 0.0.40
codegen_flags: <defaults>
</compile_context>

<pallas_src>
import jax
import jax.numpy as jnp
from jax import lax
from jax.experimental import pallas as pl
from jax.experimental.pallas import tpu as pltpu

_LANE_CHOICES = (512, 256, 128)       # lane widths to try (widest first)
_TILE_BYTES = 4 * 1024 * 1024         # ~4 MiB per input tile per buffer
_VMEM_LIMIT_BYTES = 32 * 1024 * 1024  # 2 inputs x 2 buffers x 4 MiB = 16 MiB
_FAST_PATH_MAX_BYTES = 32 * 1024      # below this, XLA's fused reduce wins
_N_PARALLEL = 2                       # leading "parallel" axis; v7x has 2 TCs


def _make_mae_kernel(*, tile_rows, lane_w, rows, steps_per_core,
                     n_full_blocks, has_ragged):
    """Build the reduction kernel with static tiling params baked in."""

    def _fold(d):
        # (tile_rows, lane_w) -> (8, lane_w): pure VALU vreg adds (the sublane
        # grouping is layout-preserving); the cross-sublane / cross-lane
        # reduces are deferred to the wrapper's final sum over tiny partials.
        return d.reshape(tile_rows // 8, 8, lane_w).sum(axis=0)

    def kernel(pred_ref, true_ref, out_ref):
        c = pl.program_id(0)   # parallel axis (sharded across TCs on v7x)
        i = pl.program_id(1)   # streaming / reduction axis

        @pl.when(i == 0)
        def _():
            out_ref[...] = jnp.zeros_like(out_ref)

        diff = jnp.abs(true_ref[...].astype(jnp.float32)
                       - pred_ref[...].astype(jnp.float32))

        if not has_ragged:
            out_ref[...] += _fold(diff).reshape(1, 8, lane_w)
        else:
            # Global block index in row space (before index_map clamping).
            g = c * steps_per_core + i

            if n_full_blocks > 0:
                @pl.when(g < n_full_blocks)
                def _():
                    out_ref[...] += _fold(diff).reshape(1, 8, lane_w)

            @pl.when(g >= n_full_blocks)
            def _():
                # The last real block overhangs `rows` (garbage rows past the
                # end), and any per-core padding block (clamped index_map) is
                # fully out of range: zero the invalid rows before adding.
                row = (lax.broadcasted_iota(jnp.int32, diff.shape, 0)
                       + g * tile_rows)
                masked = jnp.where(row < rows, diff, 0.0)
                out_ref[...] += _fold(masked).reshape(1, 8, lane_w)

    return kernel


def mape_loss(y_pred, y_true, epsilon=1e-08):
    """Matches MAPE.forward: mean(|y_true - y_pred|) over all elements."""
    # TODO(synk): epsilon is unused in the reference forward pass (the module
    # is plain MAE despite its name); kept only for signature parity.
    assert y_pred.shape == y_true.shape
    n_elem = y_pred.size
    inv_count = 1.0 / float(n_elem)
    itemsize = max(y_pred.dtype.itemsize, y_true.dtype.itemsize)

    # Tiny inputs: kernel-launch overhead dominates; let XLA fuse the reduce.
    if n_elem * itemsize <= _FAST_PATH_MAX_BYTES:
        return jnp.mean(jnp.abs(y_true.astype(jnp.float32)
                                - y_pred.astype(jnp.float32)))

    flat_p = jnp.ravel(y_pred)   # contiguous reshape: no HBM copy
    flat_t = jnp.ravel(y_true)

    # Widest lane dim that divides the element count keeps the 2D reshape a
    # free bitcast (avoids copying both inputs through jnp.pad).
    lane_w = None
    for cand in _LANE_CHOICES:
        if n_elem % cand == 0:
            lane_w = cand
            break
    if lane_w is None:
        # Ragged tail: minimal zero-pad up to a 128-lane multiple (|0-0| adds
        # nothing to the sum; inv_count uses the original element count).
        lane_w = 128
        padded = pl.cdiv(n_elem, lane_w) * lane_w
        flat_p = jnp.pad(flat_p, (0, padded - n_elem))
        flat_t = jnp.pad(flat_t, (0, padded - n_elem))

    rows = flat_p.size // lane_w
    p2d = flat_p.reshape(rows, lane_w)
    t2d = flat_t.reshape(rows, lane_w)

    # Byte-based tile sizing: ~4 MiB per input per pipeline buffer, so narrow
    # dtypes keep full-size DMAs; rounded to 32 rows (covers packed sublanes).
    tile_rows_target = max(32, ((_TILE_BYTES // itemsize) // lane_w) // 32 * 32)
    if rows > tile_rows_target:
        tile_rows = tile_rows_target
    elif rows % 8 == 0:
        tile_rows = rows                      # single full-extent block
    else:
        tile_rows = max(8, (rows // 8) * 8)   # keep blocks 8-row aligned

    total_steps = pl.cdiv(rows, tile_rows)
    n_par = _N_PARALLEL if total_steps >= 2 else 1
    steps_per_core = pl.cdiv(total_steps, n_par)
    padded_steps = n_par * steps_per_core
    n_full_blocks = rows // tile_rows               # blocks fully in range
    has_ragged = (rows % tile_rows != 0) or (padded_steps != total_steps)
    last_block = total_steps - 1

    def in_map(c, i):
        # Clamp so per-core padding blocks (when total_steps doesn't split
        # evenly across the parallel axis) re-read the last real block; the
        # kernel masks their contribution to zero.
        return (jnp.minimum(c * steps_per_core + i, last_block), 0)

    kernel = _make_mae_kernel(tile_rows=tile_rows, lane_w=lane_w, rows=rows,
                              steps_per_core=steps_per_core,
                              n_full_blocks=n_full_blocks,
                              has_ragged=has_ragged)

    partials = pl.pallas_call(
        kernel,
        out_shape=jax.ShapeDtypeStruct((n_par, 8, lane_w), jnp.float32),
        grid_spec=pltpu.PrefetchScalarGridSpec(
            num_scalar_prefetch=0,
            grid=(n_par, steps_per_core),
            in_specs=[
                pl.BlockSpec((tile_rows, lane_w), in_map),
                pl.BlockSpec((tile_rows, lane_w), in_map),
            ],
            out_specs=pl.BlockSpec((1, 8, lane_w), lambda c, i: (c, 0, 0)),
        ),
        compiler_params=pltpu.CompilerParams(
            # c: independent partials -> "parallel" (sharded across the two
            # TensorCores on v7x; harmless sequential split on v5e/v6e).
            # i: the output block is resident across it -> "arbitrary".
            dimension_semantics=("parallel", "arbitrary"),
            vmem_limit_bytes=_VMEM_LIMIT_BYTES,
        ),
    )(p2d, t2d)

    # Final tiny reduction (<= 2*8*512 floats) + mean scaling in plain XLA.
    return jnp.sum(partials) * inv_count


if __name__ == "__main__":
    key = jax.random.PRNGKey(0)
    keys = jax.random.split(key, 10)

    def check(kp, kt, shape, rtol=1e-5, atol=1e-6):
        y_pred = jax.random.normal(kp, shape, dtype=jnp.float32)
        y_true = jax.random.normal(kt, shape, dtype=jnp.float32)
        loss = mape_loss(y_pred, y_true)
        jax.block_until_ready(loss)
        ref = jnp.mean(jnp.abs(y_true - y_pred))
        assert jnp.allclose(loss, ref, rtol=rtol, atol=atol), (shape, loss, ref)
        return loss

    # 1) Small NCHW case (below the fast-path threshold).
    check(keys[0], keys[1], (2, 4, 16, 16))

    # 2) Single-block Pallas case (64 KiB, full-extent tile, grid (1, 1)).
    check(keys[2], keys[3], (4, 4, 32, 32))

    # 3) Multi-step case: 2.56M elems -> 5000 rows x 512 lanes, tile 2048.
    #    Exercises the 2-way parallel axis, the ragged last block, and the
    #    clamped/empty padding block (3 real steps split 2+2 across slices).
    check(keys[4], keys[5], (10, 16, 125, 128), rtol=2e-5)

    # 4) Even multi-step case without ragged tail (4096 rows, (2, 1) grid).
    check(keys[6], keys[7], (8, 8, 128, 256), rtol=2e-5)

    # 5) Ragged element count (33909) exercising the minimal-pad fallback and
    #    the 8-row-aligned tile rounding (rows=265 -> tile 264 + masked tail).
    check(keys[8], keys[9], (3, 89, 127))

    print("KERNEL_OK")
</pallas_src>

<mosaic_0001>
module attributes {stable_mosaic.version = 11 : i64} {
  func.func @kernel(%arg0: i32, %arg1: i32, %arg2: memref<32x512xf32, #tpu.memory_space<vmem>>, %arg3: memref<32x512xf32, #tpu.memory_space<vmem>>, %arg4: memref<1x8x512xf32, #tpu.memory_space<vmem>>) attributes {dimension_semantics = [#tpu.dimension_semantics<parallel>, #tpu.dimension_semantics<arbitrary>], iteration_bounds = array<i64: 1, 1>, scalar_prefetch = 0 : i64, scratch_operands = 0 : i64, tpu.core_type = #tpu.core_type<tc>, window_params = [{transform_indices = @transform_0, window_bounds = array<i64: 32, 512>}, {transform_indices = @transform_1, window_bounds = array<i64: 32, 512>}, {transform_indices = @transform_2, window_bounds = array<i64: 1, 8, 512>}]} {
    %c0_i32 = arith.constant 0 : i32
    %0 = arith.cmpi eq, %arg1, %c0_i32 : i32
    %1 = arith.extui %0 : i1 to i32
    %c0_i32_0 = arith.constant 0 : i32
    %2 = arith.cmpi ne, %1, %c0_i32_0 : i32
    scf.if %2 {
      %cst_10 = arith.constant 0.000000e+00 : f32
      %13 = vector.broadcast %cst_10 : f32 to vector<1x8x512xf32>
      %c0_11 = arith.constant 0 : index
      %c0_12 = arith.constant 0 : index
      %c0_13 = arith.constant 0 : index
      %14 = vector.load %arg4[%c0_11, %c0_12, %c0_13] : memref<1x8x512xf32, #tpu.memory_space<vmem>>, vector<1x8x512xf32>
      tpu.vector_store %arg4[%c0_11, %c0_12, %c0_13], %13 {strides = array<i32>} : memref<1x8x512xf32, #tpu.memory_space<vmem>>, vector<1x8x512xf32>,
    } else {
    }
    %c0 = arith.constant 0 : index
    %c0_1 = arith.constant 0 : index
    %3 = vector.load %arg3[%c0, %c0_1] : memref<32x512xf32, #tpu.memory_space<vmem>>, vector<32x512xf32>
    %c0_2 = arith.constant 0 : index
    %c0_3 = arith.constant 0 : index
    %4 = vector.load %arg2[%c0_2, %c0_3] : memref<32x512xf32, #tpu.memory_space<vmem>>, vector<32x512xf32>
    %5 = arith.subf %3, %4 : vector<32x512xf32>
    %6 = math.absf %5 : vector<32x512xf32>
    %c0_4 = arith.constant 0 : index
    %c0_5 = arith.constant 0 : index
    %c0_6 = arith.constant 0 : index
    %7 = vector.load %arg4[%c0_4, %c0_5, %c0_6] : memref<1x8x512xf32, #tpu.memory_space<vmem>>, vector<1x8x512xf32>
    %8 = vector.shape_cast %6 : vector<32x512xf32> to vector<4x8x512xf32>
    %cst = arith.constant dense<0.000000e+00> : vector<8x512xf32>
    %9 = vector.multi_reduction <add>, %8, %cst [0] : vector<4x8x512xf32> to vector<8x512xf32>
    %10 = vector.shape_cast %9 : vector<8x512xf32> to vector<1x8x512xf32>
    %11 = arith.addf %7, %10 : vector<1x8x512xf32>
    %c0_7 = arith.constant 0 : index
    %c0_8 = arith.constant 0 : index
    %c0_9 = arith.constant 0 : index
    %12 = vector.load %arg4[%c0_7, %c0_8, %c0_9] : memref<1x8x512xf32, #tpu.memory_space<vmem>>, vector<1x8x512xf32>
    tpu.vector_store %arg4[%c0_7, %c0_8, %c0_9], %11 {strides = array<i32>} : memref<1x8x512xf32, #tpu.memory_space<vmem>>, vector<1x8x512xf32>,
    return
  }
  func.func @transform_0(%arg0: i32, %arg1: i32) -> (i32, i32) {
    %c1_i32 = arith.constant 1 : i32
    %0 = arith.muli %arg0, %c1_i32 : i32
    %1 = arith.addi %0, %arg1 : i32
    %c0_i32 = arith.constant 0 : i32
    %2 = arith.minsi %1, %c0_i32 : i32
    %c0_i32_0 = arith.constant 0 : i32
    %c0_i32_1 = arith.constant 0 : i32
    return %2, %c0_i32_0 : i32, i32
  }
  func.func @transform_1(%arg0: i32, %arg1: i32) -> (i32, i32) {
    %c1_i32 = arith.constant 1 : i32
    %0 = arith.muli %arg0, %c1_i32 : i32
    %1 = arith.addi %0, %arg1 : i32
    %c0_i32 = arith.constant 0 : i32
    %2 = arith.minsi %1, %c0_i32 : i32
    %c0_i32_0 = arith.constant 0 : i32
    %c0_i32_1 = arith.constant 0 : i32
    return %2, %c0_i32_0 : i32, i32
  }
  func.func @transform_2(%arg0: i32, %arg1: i32) -> (i32, i32, i32) {
    %c0_i32 = arith.constant 0 : i32
    %c0_i32_0 = arith.constant 0 : i32
    %c0_i32_1 = arith.constant 0 : i32
    return %arg0, %c0_i32, %c0_i32_0 : i32, i32, i32
  }
}

</mosaic_0001>

<bundles_post_ra>
// kernel: tpu_custom_call.1
= control target key start
LH: loop header
LB: loop body
LE: loop exit
PB: predicated region body
PF: predicated region fallthrough
CT: control target
= control target key end

     0   :  { %7 = vsyncpa [#allocation3], 0  ;;  %s279_s0 = inlined_call_operand.hbm [shape: f32[32,512], index: 0, kind: input, shape index: {}]   ;;  %s280_s1 = inlined_call_operand.hbm [shape: f32[32,512], index: 1, kind: input, shape index: {}]   ;;  %s281_s2 = inlined_call_operand.hbm [shape: f32[1,8,512], index: 2, kind: output, shape index: {}]  }
   0x1   :  { %8 = vsyncpa [#allocation6], 0 }
   0x2   :  { %9 = vsyncpa [#allocation4], 0  ;;  %s250_s9 = smov [#allocation2]  }
   0x3   :  { %s22_s10 = sshll.u32 %s250_s9, 4  ;;  %s23_s10 = int_to_ptr.vmem [resolvable:$true] %s22_s10 }
   0x4   :  { %s192_s11 = scalar_lea.vmem %s23_s10, 2048  ;;  %p197_p1 = scmp.lt.s32.totalorder %s23_s10, %s23_s10 }
   0x5   :  { %p193_p0 = scmp.ne.s32.totalorder %s23_s10, %s192_s11  ;;  %p198_p2 = scmp.lt.s32.totalorder %s192_s11, %s192_s11 }
   0x7   :  { %p199_p3 = por %p198_p2, %p197_p1 }
   0x9   :  { %p200_p4 = pnand %p199_p3, %p193_p0 }
   0xb   :  { %203 = shalt.err (!%p200_p4)
}
   0xc   :  { %s251_s12 = smov 512   ;;  %s252_s13 = smov 32  }
   0xd   :  { %28 = dma.hbm_to_vmem [thread:$0]  %s279_s0, 2048, %s23_s10, [#allocation3], %s251_s12, %s251_s12, %s252_s13  }
   0xe   :  { %s253_s16 = smov [#allocation5]  }
   0xf   :  { %s41_s17 = sshll.u32 %s253_s16, 4  ;;  %s42_s17 = int_to_ptr.vmem [resolvable:$true] %s41_s17 }
  0x10   :  { %s212_s18 = scalar_lea.vmem %s42_s17, 2048  ;;  %p217_p6 = scmp.lt.s32.totalorder %s42_s17, %s42_s17 }
  0x11   :  { %p213_p5 = scmp.ne.s32.totalorder %s42_s17, %s212_s18  ;;  %p218_p7 = scmp.lt.s32.totalorder %s212_s18, %s212_s18 }
  0x13   :  { %p219_p8 = por %p218_p7, %p217_p6 }
  0x15   :  { %p220_p9 = pnand %p219_p8, %p213_p5 }
  0x17   :  { %223 = shalt.err (!%p220_p9)
}
  0x18   :  { %47 = dma.hbm_to_vmem [thread:$0]  %s280_s1, 2048, %s42_s17, [#allocation6], %s251_s12, %s251_s12, %s252_s13  }
  0x19   :  { %244 = dma.done.wait [#allocation3], 2048  }
  0x1a   :  { %245 = vsyncadd [#allocation3], 4294965248 }
  0x1b   :  { %246 = dma.done.wait [#allocation6], 2048  }
  0x1c   :  { %247 = vsyncadd [#allocation6], 4294965248  ;;  %v70_v0 = vld [vmem:[#allocation5] sm:$0xff]  ;;  %v71_v10 = vld [vmem:[#allocation5 + $0x8] sm:$0xff]  ;;  %s254_s0 = smov [#allocation7]  }
  0x1d   :  { %v74_v1 = vld [vmem:[#allocation5 + $0x20] sm:$0xff]  ;;  %v75_v13 = vld [vmem:[#allocation5 + $0x28] sm:$0xff]  ;;  %v72_v29 = vld [vmem:[#allocation5 + $0x10] sm:$0xff]  ;;  %s164_s1 = sshll.u32 %s254_s0, 4  ;;  %s165_s1 = int_to_ptr.vmem [resolvable:$true] %s164_s1 }
  0x1e   :  { %v78_v2 = vld [vmem:[#allocation5 + $0x40] sm:$0xff]  ;;  %v79_v14 = vld [vmem:[#allocation5 + $0x48] sm:$0xff]  ;;  %v76_v30 = vld [vmem:[#allocation5 + $0x30] sm:$0xff]  ;;  %s224_s21 = scalar_lea.vmem %s165_s1, 512  ;;  %p229_p11 = scmp.lt.s32.totalorder %s165_s1, %s165_s1 }
  0x1f   :  { %v82_v3 = vld [vmem:[#allocation5 + $0x60] sm:$0xff]  ;;  %v83_v15 = vld [vmem:[#allocation5 + $0x68] sm:$0xff]  ;;  %v80_v31 = vld [vmem:[#allocation5 + $0x50] sm:$0xff]  ;;  %p225_p10 = scmp.ne.s32.totalorder %s165_s1, %s224_s21  ;;  %p230_p12 = scmp.lt.s32.totalorder %s224_s21, %s224_s21 }
  0x20   :  { %v86_v4 = vld [vmem:[#allocation2] sm:$0xff]  ;;  %v87_v18 = vld [vmem:[#allocation2 + $0x8] sm:$0xff]  ;;  %v84_v34 = vld [vmem:[#allocation5 + $0x70] sm:$0xff] }
  0x21   :  { %v90_v5 = vld [vmem:[#allocation2 + $0x20] sm:$0xff]  ;;  %v102_v8 = vsub.f32 %v70_v0, %v86_v4  ;;  %v91_v19 = vld [vmem:[#allocation2 + $0x28] sm:$0xff]  ;;  %v103_v23 = vsub.f32 %v71_v10, %v87_v18  ;;  %v88_v35 = vld [vmem:[#allocation2 + $0x10] sm:$0xff]  ;;  %p231_p13 = por %p230_p12, %p229_p11 }
  0x22   :  { %v94_v6 = vld [vmem:[#allocation2 + $0x40] sm:$0xff]  ;;  %v106_v9 = vsub.f32 %v74_v1, %v90_v5  ;;  %v95_v21 = vld [vmem:[#allocation2 + $0x48] sm:$0xff]  ;;  %v107_v24 = vsub.f32 %v75_v13, %v91_v19  ;;  %v92_v38 = vld [vmem:[#allocation2 + $0x30] sm:$0xff]  ;;  %v104_v40 = vsub.f32 %v72_v29, %v88_v35 }
  0x23   :  { %v98_v7 = vld [vmem:[#allocation2 + $0x60] sm:$0xff]  ;;  %v110_v11 = vsub.f32 %v78_v2, %v94_v6  ;;  %v118_v16 = vand.u32 2147483647, %v102_v8  ;;  %v99_v22 = vld [vmem:[#allocation2 + $0x68] sm:$0xff]  ;;  %v111_v27 = vsub.f32 %v79_v14, %v95_v21  ;;  %v119_v32 = vand.u32 2147483647, %v103_v23  ;;  %p232_p0 = pnand %p231_p13, %p225_p10 }
  0x24   :  { %v114_v12 = vsub.f32 %v82_v3, %v98_v7  ;;  %v122_v17 = vand.u32 2147483647, %v106_v9  ;;  %v115_v28 = vsub.f32 %v83_v15, %v99_v22  ;;  %v123_v33 = vand.u32 2147483647, %v107_v24  ;;  %v96_v39 = vld [vmem:[#allocation2 + $0x50] sm:$0xff]  ;;  %v73_v46 = vld [vmem:[#allocation5 + $0x18] sm:$0xff] }
  0x25   :  { %v126_v20 = vand.u32 2147483647, %v110_v11  ;;  %v127_v37 = vand.u32 2147483647, %v111_v27  ;;  %v100_v43 = vld [vmem:[#allocation2 + $0x70] sm:$0xff]  ;;  %v108_v44 = vsub.f32 %v76_v30, %v92_v38  ;;  %v112_v45 = vsub.f32 %v80_v31, %v96_v39  ;;  %v77_v47 = vld [vmem:[#allocation5 + $0x38] sm:$0xff] }
  0x26   :  { %v130_v25 = vand.u32 2147483647, %v114_v12  ;;  %v138_v26 = vadd.f32 %v122_v17, %v118_v16  ;;  %v131_v41 = vand.u32 2147483647, %v115_v28  ;;  %v141_v42 = vadd.f32 %v123_v33, %v119_v32  ;;  %v81_v51 = vld [vmem:[#allocation5 + $0x58] sm:$0xff] }
  0x27   :  { %v116_v49 = vsub.f32 %v84_v34, %v100_v43  ;;  %v120_v50 = vand.u32 2147483647, %v104_v40  ;;  %v85_v52 = vld [vmem:[#allocation5 + $0x78] sm:$0xff]  ;;  %v124_v55 = vand.u32 2147483647, %v108_v44 }
  0x28   :  { %v139_v36 = vadd.f32 %v138_v26, %v126_v20  ;;  %v89_v53 = vld [vmem:[#allocation2 + $0x18] sm:$0xff]  ;;  %v142_v54 = vadd.f32 %v141_v42, %v127_v37  ;;  %v128_v56 = vand.u32 2147483647, %v112_v45 }
  0x29   :  { %v93_v57 = vld [vmem:[#allocation2 + $0x38] sm:$0xff]  ;;  %v105_v59 = vsub.f32 %v73_v46, %v89_v53  ;;  %v132_v60 = vand.u32 2147483647, %v116_v49  ;;  %v144_v1 = vadd.f32 %v124_v55, %v120_v50 }
  0x2a   :  { %v140_v48 = vadd.f32 %v139_v36, %v130_v25  ;;  %v97_v58 = vld [vmem:[#allocation2 + $0x58] sm:$0xff]  ;;  %v109_v62 = vsub.f32 %v77_v47, %v93_v57  ;;  %v143_v0 = vadd.f32 %v142_v54, %v131_v41 }
  0x2b   :  { %v101_v61 = vld [vmem:[#allocation2 + $0x78] sm:$0xff]  ;;  %v113_v63 = vsub.f32 %v81_v51, %v97_v58  ;;  %v121_v3 = vand.u32 2147483647, %v105_v59  ;;  %v145_v6 = vadd.f32 %v144_v1, %v128_v56 }
  0x2c   :  { %v117_v2 = vsub.f32 %v85_v52, %v101_v61  ;;  %154 = vst [vmem:[#allocation7] sm:$0xff] %v140_v48  ;;  %v125_v4 = vand.u32 2147483647, %v109_v62  ;;  %155 = vst [vmem:[#allocation7 + $0x8] sm:$0xff] %v143_v0 }
  0x2d   :  { %v129_v5 = vand.u32 2147483647, %v113_v63  ;;  %v146_v9 = vadd.f32 %v145_v6, %v132_v60 }
  0x2e   :  { %v133_v7 = vand.u32 2147483647, %v117_v2  ;;  %v147_v8 = vadd.f32 %v125_v4, %v121_v3 }
  0x2f   :  { %156 = vst [vmem:[#allocation7 + $0x10] sm:$0xff] %v146_v9 }
  0x30   :  { %v148_v10 = vadd.f32 %v147_v8, %v129_v5 }
  0x32   :  { %v149_v11 = vadd.f32 %v148_v10, %v133_v7 }
  0x34   :  { %157 = vst [vmem:[#allocation7 + $0x18] sm:$0xff] %v149_v11 }
  0x35   :  { %235 = shalt.err (!%p232_p0)
}
  0x36   :  { %167 = dma.vmem_to_hbm [thread:$0]  %s165_s1, 512, %s281_s2, [#allocation4]  }
  0x37   :  { %248 = dma.done.wait [#allocation4], 512  }
  0x38   :  { %249 = vsyncadd [#allocation4], 4294966784 }
  0x39   :  { %171 = vsyncpa [#allocation3], 1 }
  0x3a   :  { %172 = vsyncpa [#allocation6], 1 }
  0x3b   :  { %173 = vsyncpa [#allocation4], 1 }

</bundles_post_ra>
